<compile_context>
chip_gen: v7x
topology: tpu7x:2x2x1
jax: 0.10.0
libtpu: 0.0.40
codegen_flags: <defaults>
</compile_context>

<pallas_src>
import math

import numpy as np
import jax
import jax.numpy as jnp
from jax.experimental import pallas as pl
from jax.experimental.pallas import tpu as pltpu

# ----------------------------------------------------------------------------
# Model configuration (client == 1)
# ----------------------------------------------------------------------------
CARDINALITIES = [6, 3, 2, 2, 8, 3, 5, 3, 3, 5, 3, 3, 2]   # sums to 48
N_CONT = 6
N_CAT = len(CARDINALITIES)                                 # 13
RAW_DIM = N_CONT + N_CAT                                   # 19
IN_DIM = N_CONT + sum(CARDINALITIES)                       # 54 (logical)
ENC_PAD = 64                                               # padded K for layer 1
H1 = 1024
H_HID = 64                                                 # logical hidden width (layers 2-4)
HID_PAD = 128                                              # lane-dense padded hidden width
H1_CHUNK = 256                                             # layer1/layer2 overlap chunk
MAX_TB = 2048                                              # batch tile rows (upper bound)
VMEM_LIMIT_BYTES = 32 * 1024 * 1024                        # safe on v5e/v6e/v7x


def _round_up(n, m):
    return ((n + m - 1) // m) * m


def _cdiv(a, b):
    return (a + b - 1) // b


# ----------------------------------------------------------------------------
# Constant encode tables (built once, passed as VMEM-resident kernel inputs)
#   S[k, j]    = 1 if encoded lane j reads raw input column k
#   val[0, j]  = categorical value that lane j one-hot matches
#   mask[0, j] = 1 for categorical lanes (6..53), 0 for continuous / padding
# ----------------------------------------------------------------------------
def _build_encode_consts():
    S = np.zeros((RAW_DIM, ENC_PAD), np.float32)
    val = np.zeros((1, ENC_PAD), np.float32)
    mask = np.zeros((1, ENC_PAD), np.float32)
    for j in range(N_CONT):
        S[j, j] = 1.0
    lane = N_CONT
    for i, card in enumerate(CARDINALITIES):
        for v in range(card):
            S[N_CONT + i, lane] = 1.0
            val[0, lane] = float(v)
            mask[0, lane] = 1.0
            lane += 1
    assert lane == IN_DIM
    return jnp.asarray(S), jnp.asarray(val), jnp.asarray(mask)


ENC_SEL, ENC_VAL, ENC_MASK = _build_encode_consts()


# ----------------------------------------------------------------------------
# Pallas kernel: fused one-hot encode + 4-layer MLP with tanh activations
# ----------------------------------------------------------------------------
def _mlp4_kernel(x_ref, sel_ref, val_ref, mask_ref,
                 w1_ref, b1_ref,
                 w2_ref, b2_ref,
                 w3_ref, b3_ref,
                 w4_ref, b4_ref,
                 out_ref):
    x = x_ref[...]                                                  # (TB, 19) f32

    # --- in-kernel one-hot encode -> (TB, 64); lanes 54..63 are zero padding
    x_sel = jnp.dot(x, sel_ref[...], preferred_element_type=jnp.float32)
    is_cat = mask_ref[...] > 0.5                                    # (1, 64)
    onehot = (jnp.trunc(x_sel) == val_ref[...]).astype(jnp.float32)  # .long() semantics
    enc = jnp.where(is_cat, onehot, x_sel).astype(jnp.bfloat16)     # (TB, 64) bf16

    # --- layer1 + layer2 chunked over H1 so EUP tanh overlaps MXU matmuls,
    #     and the live h1 temporary is only (TB, H1_CHUNK).
    acc2 = None                                                     # (TB, 128) f32
    for c in range(H1 // H1_CHUNK):
        cs, ce = c * H1_CHUNK, (c + 1) * H1_CHUNK
        pre1 = jnp.dot(enc, w1_ref[:, cs:ce],
                       preferred_element_type=jnp.float32) + b1_ref[:, cs:ce]
        h1_c = jnp.tanh(pre1).astype(jnp.bfloat16)                  # (TB, 256)
        part = jnp.dot(h1_c, w2_ref[cs:ce, :],
                       preferred_element_type=jnp.float32)          # (TB, 128)
        acc2 = part if acc2 is None else acc2 + part
    h2 = jnp.tanh(acc2 + b2_ref[...]).astype(jnp.bfloat16)          # (TB, 128)

    # --- layers 3 and 4 (hidden dims zero-padded 64 -> 128: exact)
    h3 = jnp.tanh(jnp.dot(h2, w3_ref[...],
                          preferred_element_type=jnp.float32)
                  + b3_ref[...]).astype(jnp.bfloat16)               # (TB, 128)
    h4 = jnp.tanh(jnp.dot(h3, w4_ref[...],
                          preferred_element_type=jnp.float32)
                  + b4_ref[...])                                    # (TB, 64) f32
    out_ref[...] = h4.astype(out_ref.dtype)


def _mlp4_pallas(x_raw, padded_params):
    """x_raw: [B, 19] float32.  Returns [B, 64] float32."""
    B = x_raw.shape[0]
    # Pick TB so the grid always has >= 2 steps (v7x megacore sharding), and
    # cap it so the largest live value stays well under the 32 MiB VMEM limit.
    TB = min(MAX_TB, _round_up(max(_cdiv(B, 2), 1), 8))
    n_steps = max(2, _cdiv(B, TB))
    Bp = n_steps * TB
    if Bp != B:
        x_raw = jnp.pad(x_raw, ((0, Bp - B), (0, 0)))

    resident = (ENC_SEL, ENC_VAL, ENC_MASK) + tuple(padded_params)
    # Weights / constants: full-array blocks with a constant index_map ->
    # DMA'd once, stay VMEM-resident across the whole batch grid.
    resident_specs = [pl.BlockSpec(p.shape, lambda i: (0, 0)) for p in resident]

    out = pl.pallas_call(
        _mlp4_kernel,
        out_shape=jax.ShapeDtypeStruct((Bp, H_HID), jnp.float32),
        grid=(n_steps,),
        in_specs=[pl.BlockSpec((TB, RAW_DIM), lambda i: (i, 0))] + resident_specs,
        out_specs=pl.BlockSpec((TB, H_HID), lambda i: (i, 0)),
        compiler_params=pltpu.CompilerParams(
            dimension_semantics=("parallel",),
            vmem_limit_bytes=VMEM_LIMIT_BYTES),
    )(x_raw, *resident)
    # Only row-slice when the batch was padded; no column slice (output is
    # already the logical 64-wide result).
    return out if Bp == B else out[:B]


# ----------------------------------------------------------------------------
# Parameter init (matches PyTorch nn.Linear default init:
#   W, b ~ U(-1/sqrt(fan_in), 1/sqrt(fan_in)) ), logical (unpadded) f32 shapes.
# ----------------------------------------------------------------------------
def init_params(key):
    dims = [(IN_DIM, H1), (H1, H_HID), (H_HID, H_HID), (H_HID, H_HID)]
    params = []
    for (fan_in, fan_out) in dims:
        key, kw, kb = jax.random.split(key, 3)
        bound = 1.0 / math.sqrt(fan_in)
        w = jax.random.uniform(kw, (fan_in, fan_out), jnp.float32,
                               minval=-bound, maxval=bound)
        b = jax.random.uniform(kb, (1, fan_out), jnp.float32,
                               minval=-bound, maxval=bound)
        params.extend([w, b])
    return tuple(params)


def pad_params(params):
    """Zero-pad for sublane/lane density and cast weights to bf16.

      W1 rows 54->64; W2 cols, b2, W3 rows+cols, b3, W4 rows 64->128.
    All padding is with zeros, which is numerically exact (tanh(0)=0, zero
    rows/cols contribute nothing). Biases stay f32 (added to the f32 acc).
    """
    w1, b1, w2, b2, w3, b3, w4, b4 = params
    pad = HID_PAD - H_HID
    w1p = jnp.pad(w1, ((0, ENC_PAD - IN_DIM), (0, 0))).astype(jnp.bfloat16)   # [64, 1024]
    w2p = jnp.pad(w2, ((0, 0), (0, pad))).astype(jnp.bfloat16)                # [1024, 128]
    b2p = jnp.pad(b2, ((0, 0), (0, pad)))                                     # [1, 128]
    w3p = jnp.pad(w3, ((0, pad), (0, pad))).astype(jnp.bfloat16)              # [128, 128]
    b3p = jnp.pad(b3, ((0, 0), (0, pad)))                                     # [1, 128]
    w4p = jnp.pad(w4, ((0, pad), (0, 0))).astype(jnp.bfloat16)                # [128, 64]
    return (w1p, b1, w2p, b2p, w3p, b3p, w4p, b4)


# ----------------------------------------------------------------------------
# Forward pass (client == 1)
# ----------------------------------------------------------------------------
def forward(x, params, client=1):
    assert client == 1, "only the client==1 path is implemented"
    # TODO(synk): the reference module raises ValueError on NaN in x (host-side
    # numpy check); that host-side check has no equivalent inside the jitted /
    # Pallas path and is skipped.
    padded = pad_params(params)
    return _mlp4_pallas(x.astype(jnp.float32), padded)


# ----------------------------------------------------------------------------
# Pure-JAX reference (same bf16 weight/activation precision as the kernel)
# ----------------------------------------------------------------------------
def reference_forward(x, params):
    cont = x[:, :N_CONT]
    pieces = [cont]
    for i, card in enumerate(CARDINALITIES):
        idx = x[:, N_CONT + i].astype(jnp.int32)
        pieces.append(jax.nn.one_hot(idx, card, dtype=jnp.float32))
    h = jnp.concatenate(pieces, axis=1)                       # [B, 54]
    for w, b in zip(params[0::2], params[1::2]):
        h = jnp.tanh(jnp.dot(h.astype(jnp.bfloat16), w.astype(jnp.bfloat16),
                             preferred_element_type=jnp.float32) + b)
    return h


# ----------------------------------------------------------------------------
# Demo
# ----------------------------------------------------------------------------
if __name__ == "__main__":
    key = jax.random.PRNGKey(0)
    key, k_cont, k_cat, k_params = jax.random.split(key, 4)

    B = 8
    # continuous features
    cont = jax.random.normal(k_cont, (B, N_CONT), jnp.float32)
    # categorical features: valid integer indices per column's cardinality
    cat_cols = []
    cat_keys = jax.random.split(k_cat, len(CARDINALITIES))
    for ck, card in zip(cat_keys, CARDINALITIES):
        col = jax.random.randint(ck, (B, 1), 0, card).astype(jnp.float32)
        cat_cols.append(col)
    x = jnp.concatenate([cont] + cat_cols, axis=1)    # [B, 19]

    params = init_params(k_params)

    out = forward(x, params, client=1)
    out = jax.block_until_ready(out)
    assert out.shape == (B, H_HID), out.shape
    assert bool(jnp.all(jnp.isfinite(out)))

    ref = jax.block_until_ready(reference_forward(x, params))
    assert bool(jnp.max(jnp.abs(out - ref)) < 3e-2), float(jnp.max(jnp.abs(out - ref)))

    print("KERNEL_OK")
</pallas_src>

<mosaic_0001>
module attributes {stable_mosaic.version = 11 : i64} {
  func.func @_mlp4_kernel(%arg0: i32, %arg1: memref<8x19xf32, #tpu.memory_space<vmem>>, %arg2: memref<19x64xf32, #tpu.memory_space<vmem>>, %arg3: memref<1x64xf32, #tpu.memory_space<vmem>>, %arg4: memref<1x64xf32, #tpu.memory_space<vmem>>, %arg5: memref<64x1024xbf16, #tpu.memory_space<vmem>>, %arg6: memref<1x1024xf32, #tpu.memory_space<vmem>>, %arg7: memref<1024x128xbf16, #tpu.memory_space<vmem>>, %arg8: memref<1x128xf32, #tpu.memory_space<vmem>>, %arg9: memref<128x128xbf16, #tpu.memory_space<vmem>>, %arg10: memref<1x128xf32, #tpu.memory_space<vmem>>, %arg11: memref<128x64xbf16, #tpu.memory_space<vmem>>, %arg12: memref<1x64xf32, #tpu.memory_space<vmem>>, %arg13: memref<8x64xf32, #tpu.memory_space<vmem>>) attributes {dimension_semantics = [#tpu.dimension_semantics<parallel>], iteration_bounds = array<i64: 2>, scalar_prefetch = 0 : i64, scratch_operands = 0 : i64, tpu.core_type = #tpu.core_type<tc>, window_params = [{transform_indices = @transform_0, window_bounds = array<i64: 8, 19>}, {pipeline_mode = #tpu.pipeline_mode<synchronous>, transform_indices = @transform_1, window_bounds = array<i64: 19, 64>}, {pipeline_mode = #tpu.pipeline_mode<synchronous>, transform_indices = @transform_2, window_bounds = array<i64: 1, 64>}, {pipeline_mode = #tpu.pipeline_mode<synchronous>, transform_indices = @transform_3, window_bounds = array<i64: 1, 64>}, {pipeline_mode = #tpu.pipeline_mode<synchronous>, transform_indices = @transform_4, window_bounds = array<i64: 64, 1024>}, {pipeline_mode = #tpu.pipeline_mode<synchronous>, transform_indices = @transform_5, window_bounds = array<i64: 1, 1024>}, {pipeline_mode = #tpu.pipeline_mode<synchronous>, transform_indices = @transform_6, window_bounds = array<i64: 1024, 128>}, {pipeline_mode = #tpu.pipeline_mode<synchronous>, transform_indices = @transform_7, window_bounds = array<i64: 1, 128>}, {pipeline_mode = #tpu.pipeline_mode<synchronous>, transform_indices = @transform_8, window_bounds = array<i64: 128, 128>}, {pipeline_mode = #tpu.pipeline_mode<synchronous>, transform_indices = @transform_9, window_bounds = array<i64: 1, 128>}, {pipeline_mode = #tpu.pipeline_mode<synchronous>, transform_indices = @transform_10, window_bounds = array<i64: 128, 64>}, {pipeline_mode = #tpu.pipeline_mode<synchronous>, transform_indices = @transform_11, window_bounds = array<i64: 1, 64>}, {transform_indices = @transform_12, window_bounds = array<i64: 8, 64>}]} {
    %c0 = arith.constant 0 : index
    %c0_0 = arith.constant 0 : index
    %0 = vector.load %arg1[%c0, %c0_0] : memref<8x19xf32, #tpu.memory_space<vmem>>, vector<8x19xf32>
    %c0_1 = arith.constant 0 : index
    %c0_2 = arith.constant 0 : index
    %1 = vector.load %arg2[%c0_1, %c0_2] : memref<19x64xf32, #tpu.memory_space<vmem>>, vector<19x64xf32>
    %cst = arith.constant dense<0.000000e+00> : vector<8x64xf32>
    %2 = tpu.matmul %0, %1, %cst {dimension_numbers = #tpu.dot_dimension_numbers<[1], [0], [0], [1], [0, 0, 1, 1], [], []>} : vector<8x19xf32>, vector<19x64xf32>, vector<8x64xf32> -> vector<8x64xf32>
    %c0_3 = arith.constant 0 : index
    %c0_4 = arith.constant 0 : index
    %3 = vector.load %arg4[%c0_3, %c0_4] : memref<1x64xf32, #tpu.memory_space<vmem>>, vector<1x64xf32>
    %cst_5 = arith.constant 5.000000e-01 : f32
    %4 = vector.broadcast %cst_5 : f32 to vector<1x64xf32>
    %5 = arith.cmpf ogt, %3, %4 : vector<1x64xf32>
    %cst_6 = arith.constant 0.000000e+00 : f32
    %6 = vector.broadcast %cst_6 : f32 to vector<8x64xf32>
    %7 = arith.cmpf olt, %2, %6 : vector<8x64xf32>
    %8 = math.ceil %2 : vector<8x64xf32>
    %9 = math.floor %2 : vector<8x64xf32>
    %10 = arith.select %7, %8, %9 : vector<8x64xi1>, vector<8x64xf32>
    %c0_7 = arith.constant 0 : index
    %c0_8 = arith.constant 0 : index
    %11 = vector.load %arg3[%c0_7, %c0_8] : memref<1x64xf32, #tpu.memory_space<vmem>>, vector<1x64xf32>
    %12 = vector.broadcast %11 : vector<1x64xf32> to vector<8x64xf32>
    %13 = arith.cmpf oeq, %10, %12 : vector<8x64xf32>
    %14 = arith.extui %13 : vector<8x64xi1> to vector<8x64xi32>
    %15 = arith.sitofp %14 : vector<8x64xi32> to vector<8x64xf32>
    %16 = vector.shape_cast %5 : vector<1x64xi1> to vector<1x64xi1>
    %17 = vector.broadcast %16 : vector<1x64xi1> to vector<8x64xi1>
    %18 = arith.select %17, %15, %2 : vector<8x64xi1>, vector<8x64xf32>
    %19 = arith.truncf %18 : vector<8x64xf32> to vector<8x64xbf16>
    %c0_9 = arith.constant 0 : index
    %c0_10 = arith.constant 0 : index
    %20 = vector.load %arg5[%c0_9, %c0_10] : memref<64x1024xbf16, #tpu.memory_space<vmem>>, vector<64x256xbf16>
    %cst_11 = arith.constant dense<0.000000e+00> : vector<8x256xf32>
    %21 = tpu.matmul %19, %20, %cst_11 {dimension_numbers = #tpu.dot_dimension_numbers<[1], [0], [0], [1], [0, 0, 1, 1], [], []>} : vector<8x64xbf16>, vector<64x256xbf16>, vector<8x256xf32> -> vector<8x256xf32>
    %c0_12 = arith.constant 0 : index
    %c0_13 = arith.constant 0 : index
    %22 = vector.load %arg6[%c0_12, %c0_13] : memref<1x1024xf32, #tpu.memory_space<vmem>>, vector<1x256xf32>
    %23 = vector.broadcast %22 : vector<1x256xf32> to vector<8x256xf32>
    %24 = arith.addf %21, %23 : vector<8x256xf32>
    %25 = math.tanh %24 : vector<8x256xf32>
    %26 = arith.truncf %25 : vector<8x256xf32> to vector<8x256xbf16>
    %c0_14 = arith.constant 0 : index
    %c0_15 = arith.constant 0 : index
    %27 = vector.load %arg7[%c0_14, %c0_15] : memref<1024x128xbf16, #tpu.memory_space<vmem>>, vector<256x128xbf16>
    %cst_16 = arith.constant dense<0.000000e+00> : vector<8x128xf32>
    %28 = tpu.matmul %26, %27, %cst_16 {dimension_numbers = #tpu.dot_dimension_numbers<[1], [0], [0], [1], [0, 0, 1, 1], [], []>} : vector<8x256xbf16>, vector<256x128xbf16>, vector<8x128xf32> -> vector<8x128xf32>
    %c0_17 = arith.constant 0 : index
    %c256 = arith.constant 256 : index
    %29 = vector.load %arg5[%c0_17, %c256] : memref<64x1024xbf16, #tpu.memory_space<vmem>>, vector<64x256xbf16>
    %cst_18 = arith.constant dense<0.000000e+00> : vector<8x256xf32>
    %30 = tpu.matmul %19, %29, %cst_18 {dimension_numbers = #tpu.dot_dimension_numbers<[1], [0], [0], [1], [0, 0, 1, 1], [], []>} : vector<8x64xbf16>, vector<64x256xbf16>, vector<8x256xf32> -> vector<8x256xf32>
    %c0_19 = arith.constant 0 : index
    %c256_20 = arith.constant 256 : index
    %31 = vector.load %arg6[%c0_19, %c256_20] : memref<1x1024xf32, #tpu.memory_space<vmem>>, vector<1x256xf32>
    %32 = vector.broadcast %31 : vector<1x256xf32> to vector<8x256xf32>
    %33 = arith.addf %30, %32 : vector<8x256xf32>
    %34 = math.tanh %33 : vector<8x256xf32>
    %35 = arith.truncf %34 : vector<8x256xf32> to vector<8x256xbf16>
    %c256_21 = arith.constant 256 : index
    %c0_22 = arith.constant 0 : index
    %36 = vector.load %arg7[%c256_21, %c0_22] : memref<1024x128xbf16, #tpu.memory_space<vmem>>, vector<256x128xbf16>
    %cst_23 = arith.constant dense<0.000000e+00> : vector<8x128xf32>
    %37 = tpu.matmul %35, %36, %cst_23 {dimension_numbers = #tpu.dot_dimension_numbers<[1], [0], [0], [1], [0, 0, 1, 1], [], []>} : vector<8x256xbf16>, vector<256x128xbf16>, vector<8x128xf32> -> vector<8x128xf32>
    %38 = arith.addf %28, %37 : vector<8x128xf32>
    %c0_24 = arith.constant 0 : index
    %c512 = arith.constant 512 : index
    %39 = vector.load %arg5[%c0_24, %c512] : memref<64x1024xbf16, #tpu.memory_space<vmem>>, vector<64x256xbf16>
    %cst_25 = arith.constant dense<0.000000e+00> : vector<8x256xf32>
    %40 = tpu.matmul %19, %39, %cst_25 {dimension_numbers = #tpu.dot_dimension_numbers<[1], [0], [0], [1], [0, 0, 1, 1], [], []>} : vector<8x64xbf16>, vector<64x256xbf16>, vector<8x256xf32> -> vector<8x256xf32>
    %c0_26 = arith.constant 0 : index
    %c512_27 = arith.constant 512 : index
    %41 = vector.load %arg6[%c0_26, %c512_27] : memref<1x1024xf32, #tpu.memory_space<vmem>>, vector<1x256xf32>
    %42 = vector.broadcast %41 : vector<1x256xf32> to vector<8x256xf32>
    %43 = arith.addf %40, %42 : vector<8x256xf32>
    %44 = math.tanh %43 : vector<8x256xf32>
    %45 = arith.truncf %44 : vector<8x256xf32> to vector<8x256xbf16>
    %c512_28 = arith.constant 512 : index
    %c0_29 = arith.constant 0 : index
    %46 = vector.load %arg7[%c512_28, %c0_29] : memref<1024x128xbf16, #tpu.memory_space<vmem>>, vector<256x128xbf16>
    %cst_30 = arith.constant dense<0.000000e+00> : vector<8x128xf32>
    %47 = tpu.matmul %45, %46, %cst_30 {dimension_numbers = #tpu.dot_dimension_numbers<[1], [0], [0], [1], [0, 0, 1, 1], [], []>} : vector<8x256xbf16>, vector<256x128xbf16>, vector<8x128xf32> -> vector<8x128xf32>
    %48 = arith.addf %38, %47 : vector<8x128xf32>
    %c0_31 = arith.constant 0 : index
    %c768 = arith.constant 768 : index
    %49 = vector.load %arg5[%c0_31, %c768] : memref<64x1024xbf16, #tpu.memory_space<vmem>>, vector<64x256xbf16>
    %cst_32 = arith.constant dense<0.000000e+00> : vector<8x256xf32>
    %50 = tpu.matmul %19, %49, %cst_32 {dimension_numbers = #tpu.dot_dimension_numbers<[1], [0], [0], [1], [0, 0, 1, 1], [], []>} : vector<8x64xbf16>, vector<64x256xbf16>, vector<8x256xf32> -> vector<8x256xf32>
    %c0_33 = arith.constant 0 : index
    %c768_34 = arith.constant 768 : index
    %51 = vector.load %arg6[%c0_33, %c768_34] : memref<1x1024xf32, #tpu.memory_space<vmem>>, vector<1x256xf32>
    %52 = vector.broadcast %51 : vector<1x256xf32> to vector<8x256xf32>
    %53 = arith.addf %50, %52 : vector<8x256xf32>
    %54 = math.tanh %53 : vector<8x256xf32>
    %55 = arith.truncf %54 : vector<8x256xf32> to vector<8x256xbf16>
    %c768_35 = arith.constant 768 : index
    %c0_36 = arith.constant 0 : index
    %56 = vector.load %arg7[%c768_35, %c0_36] : memref<1024x128xbf16, #tpu.memory_space<vmem>>, vector<256x128xbf16>
    %cst_37 = arith.constant dense<0.000000e+00> : vector<8x128xf32>
    %57 = tpu.matmul %55, %56, %cst_37 {dimension_numbers = #tpu.dot_dimension_numbers<[1], [0], [0], [1], [0, 0, 1, 1], [], []>} : vector<8x256xbf16>, vector<256x128xbf16>, vector<8x128xf32> -> vector<8x128xf32>
    %58 = arith.addf %48, %57 : vector<8x128xf32>
    %c0_38 = arith.constant 0 : index
    %c0_39 = arith.constant 0 : index
    %59 = vector.load %arg8[%c0_38, %c0_39] : memref<1x128xf32, #tpu.memory_space<vmem>>, vector<1x128xf32>
    %60 = vector.broadcast %59 : vector<1x128xf32> to vector<8x128xf32>
    %61 = arith.addf %58, %60 : vector<8x128xf32>
    %62 = math.tanh %61 : vector<8x128xf32>
    %63 = arith.truncf %62 : vector<8x128xf32> to vector<8x128xbf16>
    %c0_40 = arith.constant 0 : index
    %c0_41 = arith.constant 0 : index
    %64 = vector.load %arg9[%c0_40, %c0_41] : memref<128x128xbf16, #tpu.memory_space<vmem>>, vector<128x128xbf16>
    %cst_42 = arith.constant dense<0.000000e+00> : vector<8x128xf32>
    %65 = tpu.matmul %63, %64, %cst_42 {dimension_numbers = #tpu.dot_dimension_numbers<[1], [0], [0], [1], [0, 0, 1, 1], [], []>} : vector<8x128xbf16>, vector<128x128xbf16>, vector<8x128xf32> -> vector<8x128xf32>
    %c0_43 = arith.constant 0 : index
    %c0_44 = arith.constant 0 : index
    %66 = vector.load %arg10[%c0_43, %c0_44] : memref<1x128xf32, #tpu.memory_space<vmem>>, vector<1x128xf32>
    %67 = vector.broadcast %66 : vector<1x128xf32> to vector<8x128xf32>
    %68 = arith.addf %65, %67 : vector<8x128xf32>
    %69 = math.tanh %68 : vector<8x128xf32>
    %70 = arith.truncf %69 : vector<8x128xf32> to vector<8x128xbf16>
    %c0_45 = arith.constant 0 : index
    %c0_46 = arith.constant 0 : index
    %71 = vector.load %arg11[%c0_45, %c0_46] : memref<128x64xbf16, #tpu.memory_space<vmem>>, vector<128x64xbf16>
    %cst_47 = arith.constant dense<0.000000e+00> : vector<8x64xf32>
    %72 = tpu.matmul %70, %71, %cst_47 {dimension_numbers = #tpu.dot_dimension_numbers<[1], [0], [0], [1], [0, 0, 1, 1], [], []>} : vector<8x128xbf16>, vector<128x64xbf16>, vector<8x64xf32> -> vector<8x64xf32>
    %c0_48 = arith.constant 0 : index
    %c0_49 = arith.constant 0 : index
    %73 = vector.load %arg12[%c0_48, %c0_49] : memref<1x64xf32, #tpu.memory_space<vmem>>, vector<1x64xf32>
    %74 = vector.broadcast %73 : vector<1x64xf32> to vector<8x64xf32>
    %75 = arith.addf %72, %74 : vector<8x64xf32>
    %76 = math.tanh %75 : vector<8x64xf32>
    %c0_50 = arith.constant 0 : index
    %c0_51 = arith.constant 0 : index
    %77 = vector.load %arg13[%c0_50, %c0_51] : memref<8x64xf32, #tpu.memory_space<vmem>>, vector<8x64xf32>
    tpu.vector_store %arg13[%c0_50, %c0_51], %76 {strides = array<i32>} : memref<8x64xf32, #tpu.memory_space<vmem>>, vector<8x64xf32>,
    return
  }
  func.func @transform_0(%arg0: i32) -> (i32, i32) {
    %c0_i32 = arith.constant 0 : i32
    %c0_i32_0 = arith.constant 0 : i32
    return %arg0, %c0_i32 : i32, i32
  }
  func.func @transform_1(%arg0: i32) -> (i32, i32) {
    %c0_i32 = arith.constant 0 : i32
    %c0_i32_0 = arith.constant 0 : i32
    %c0_i32_1 = arith.constant 0 : i32
    return %c0_i32, %c0_i32_0 : i32, i32
  }
  func.func @transform_2(%arg0: i32) -> (i32, i32) {
    %c0_i32 = arith.constant 0 : i32
    %c0_i32_0 = arith.constant 0 : i32
    %c0_i32_1 = arith.constant 0 : i32
    return %c0_i32, %c0_i32_0 : i32, i32
  }
  func.func @transform_3(%arg0: i32) -> (i32, i32) {
    %c0_i32 = arith.constant 0 : i32
    %c0_i32_0 = arith.constant 0 : i32
    %c0_i32_1 = arith.constant 0 : i32
    return %c0_i32, %c0_i32_0 : i32, i32
  }
  func.func @transform_4(%arg0: i32) -> (i32, i32) {
    %c0_i32 = arith.constant 0 : i32
    %c0_i32_0 = arith.constant 0 : i32
    %c0_i32_1 = arith.constant 0 : i32
    return %c0_i32, %c0_i32_0 : i32, i32
  }
  func.func @transform_5(%arg0: i32) -> (i32, i32) {
    %c0_i32 = arith.constant 0 : i32
    %c0_i32_0 = arith.constant 0 : i32
    %c0_i32_1 = arith.constant 0 : i32
    return %c0_i32, %c0_i32_0 : i32, i32
  }
  func.func @transform_6(%arg0: i32) -> (i32, i32) {
    %c0_i32 = arith.constant 0 : i32
    %c0_i32_0 = arith.constant 0 : i32
    %c0_i32_1 = arith.constant 0 : i32
    return %c0_i32, %c0_i32_0 : i32, i32
  }
  func.func @transform_7(%arg0: i32) -> (i32, i32) {
    %c0_i32 = arith.constant 0 : i32
    %c0_i32_0 = arith.constant 0 : i32
    %c0_i32_1 = arith.constant 0 : i32
    return %c0_i32, %c0_i32_0 : i32, i32
  }
  func.func @transform_8(%arg0: i32) -> (i32, i32) {
    %c0_i32 = arith.constant 0 : i32
    %c0_i32_0 = arith.constant 0 : i32
    %c0_i32_1 = arith.constant 0 : i32
    return %c0_i32, %c0_i32_0 : i32, i32
  }
  func.func @transform_9(%arg0: i32) -> (i32, i32) {
    %c0_i32 = arith.constant 0 : i32
    %c0_i32_0 = arith.constant 0 : i32
    %c0_i32_1 = arith.constant 0 : i32
    return %c0_i32, %c0_i32_0 : i32, i32
  }
  func.func @transform_10(%arg0: i32) -> (i32, i32) {
    %c0_i32 = arith.constant 0 : i32
    %c0_i32_0 = arith.constant 0 : i32
    %c0_i32_1 = arith.constant 0 : i32
    return %c0_i32, %c0_i32_0 : i32, i32
  }
  func.func @transform_11(%arg0: i32) -> (i32, i32) {
    %c0_i32 = arith.constant 0 : i32
    %c0_i32_0 = arith.constant 0 : i32
    %c0_i32_1 = arith.constant 0 : i32
    return %c0_i32, %c0_i32_0 : i32, i32
  }
  func.func @transform_12(%arg0: i32) -> (i32, i32) {
    %c0_i32 = arith.constant 0 : i32
    %c0_i32_0 = arith.constant 0 : i32
    return %arg0, %c0_i32 : i32, i32
  }
}

</mosaic_0001>

<bundles_post_ra>
// kernel: tpu_custom_call.1
= control target key start
LH: loop header
LB: loop body
LE: loop exit
PB: predicated region body
PF: predicated region fallthrough
CT: control target
= control target key end

     0   :  { %s3092_s0 = inlined_call_operand.hbm [shape: f32[16,19], index: 0, kind: input, shape index: {}]   ;;  %s3093_s1 = inlined_call_operand.vmem [shape: f32[19,64], index: 1, kind: input, shape index: {}]   ;;  %s3094_s2 = inlined_call_operand.vmem [shape: f32[1,64], index: 2, kind: input, shape index: {}]   ;;  %s3095_s3 = inlined_call_operand.vmem [shape: f32[1,64], index: 3, kind: input, shape index: {}]   ;;  %s3096_s4 = inlined_call_operand.hbm [shape: bf16[64,1024], index: 4, kind: input, shape index: {}]   ;;  %s3097_s5 = inlined_call_operand.vmem [shape: f32[1,1024], index: 5, kind: input, shape index: {}]   ;;  %s3098_s6 = inlined_call_operand.hbm [shape: bf16[1024,128], index: 6, kind: input, shape index: {}]   ;;  %s3099_s7 = inlined_call_operand.vmem [shape: f32[1,128], index: 7, kind: input, shape index: {}]   ;;  %s3100_s8 = inlined_call_operand.vmem [shape: bf16[128,128], index: 8, kind: input, shape index: {}]   ;;  %s3101_s9 = inlined_call_operand.vmem [shape: f32[1,128], index: 9, kind: input, shape index: {}]   ;;  %s3102_s10 = inlined_call_operand.vmem [shape: bf16[128,64], index: 10, kind: input, shape index: {}]   ;;  %s3103_s11 = inlined_call_operand.vmem [shape: f32[1,64], index: 11, kind: input, shape index: {}]   ;;  %s3104_s12 = inlined_call_operand.hbm [shape: f32[16,64], index: 12, kind: output, shape index: {}]  }
   0x1   :  { %3111 = sst [smem:[#allocation14_spill]] %s3103_s11 }
   0x2   :  { %3112 = sst [smem:[#allocation15_spill]] %s3104_s12 }
   0x3   :  { %17 = vsyncpa [#allocation3], 0 }
   0x4   :  { %19 = vsyncpa [#allocation3 + $0x1], 0 }
   0x5   :  { %20 = vsyncpa [#allocation6], 0 }
   0x6   :  { %21 = vsyncpa [#allocation4], 0 }
   0x7   :  { %23 = vsyncpa [#allocation4 + $0x1], 0  ;;  %s2715_s21 = smov 0   ;;  %s2717_s22 = smov 0  }
   0x8   :  { %s2719_s23 = smov 0   ;;  %s2721_s24 = smov 0  }
   0x9 LB: > { %3113 = sst [smem:[#allocation12_spill]] %s2624_s21  ;;  %s2736_s25 = sadd.s32 4294967295, %s2636_s24   ;;  %s2636_s24 = sphi %s2721_s24, %s3135_s24   ;;  %s2632_s23 = sphi %s2719_s23, %s3134_s23   ;;  %s2628_s22 = sphi %s2717_s22, %s3133_s22   ;;  %s2624_s21 = sphi %s2715_s21, %s3132_s21  }
   0xa   : > { %s2002_s26 = sadd.s32 4294967294, %s2636_s24   ;;  %p49_p0 = scmp.ne.s32.totalorder %s2628_s22, %s2624_s21 }
   0xb   : > { %p3106_p1 = scmp.eq.s32.totalorder %s2736_s25, 0  ;;  %p310_p3 = scmp.eq.s32.totalorder %s2002_s26, 1 }
   0xc   : > { %p2003_p5 = scmp.ge.s32.totalorder %s2636_s24, 1  ;;  %p317_p7 = scmp.lt.s32.totalorder %s2636_s24, 3 }
   0xd   : > { %p2745_p4 = por %p3106_p1, %p49_p0  ;;  %p2750_p6 = por %p310_p3, %p49_p0 }
   0xe   : > { %p2755_p8 = pnand %p2003_p5, %p317_p7  ;;  %s2638_s30 = smov [#allocation5]  }
   0xf   : > { %s3114_s27 = scalar_select %p2745_p4, 1, 0 }
  0x10   : > { %s3115_s28 = scalar_select %p2750_p6, 1, 0 }
  0x11   : > { %s338_s13 = sshll.u32 %s2638_s30, 4  ;;  %p2315_p9 = pneg %p2755_p8  ;;  %s2759_s13 = int_to_ptr.vmem [resolvable:$true] %s338_s13 }
  0x12   : > { %3116 = sst [smem:[#allocation13_spill]] %s3115_s28  ;;  %s2639_s15 = smov [#allocation7]  }
  0x13   : > { %p2766_p11 = pnand %p2315_p9, %p3106_p1  ;;  %s354_s16 = sshll.u32 %s2639_s15, 4  ;;  %s2770_s16 = int_to_ptr.vmem [resolvable:$true] %s354_s16 }
  0x14   : > { %s2480_s19 = scalar_lea.hbm %s3096_s4, 4096 }
  0x15   : > { %p2481_p12 = scmp.ne.s32.totalorder %s3096_s4, %s2480_s19  ;;  %p2482_p13 = pneg %p2766_p11 }
  0x16   : > { %p2487_p5 = scmp.lt.u32.totalorder %s2480_s19, %s3096_s4 }
  0x17   : > { %p2483_p0 = pnand %p2482_p13, %p2481_p12 }
  0x19   : > { %p2484_p3 = pneg %p2483_p0 }
  0x1b   : > { %p2489_p7 = pnand %p2487_p5, %p2484_p3 }
  0x1d   : > { %2492 = shalt.err (!%p2489_p7)
}
  0x1e   : > { %s2493_s15 = scalar_lea.vmem %s2759_s13, 4096  ;;  %p2501_p2 = scmp.lt.s32.totalorder %s2759_s13, %s2759_s13 }
  0x1f   : > { %p2494_p9 = scmp.ne.s32.totalorder %s2759_s13, %s2493_s15  ;;  %p2502_p12 = scmp.lt.s32.totalorder %s2493_s15, %s2493_s15 }
  0x21   : > { %p2496_p10 = pnand %p2494_p9, %p2482_p13  ;;  %p2503_p0 = por %p2502_p12, %p2501_p2 }
  0x23   : > { %p2497_p1 = pneg %p2496_p10 }
  0x25   : > { %p2504_p6 = pnand %p2503_p0, %p2497_p1 }
  0x27   : > { %2507 = shalt.err (!%p2504_p6)
}
  0x28   : > { %s2640_s28 = smov 512   ;;  %s2641_s17 = smov 32  }
  0x29   : > { %2318 = dma.hbm_to_vmem [thread:$0]  (!%p2766_p11), %s3096_s4, 4096, %s2759_s13, [#allocation6], %s2640_s28, %s2640_s28, %s2641_s17  }
  0x2a   : > { %s2508_s30 = scalar_lea.hbm %s3098_s6, 8192 }
  0x2b   : > { %p2509_p2 = scmp.ne.s32.totalorder %s3098_s6, %s2508_s30  ;;  %p2515_p10 = scmp.lt.u32.totalorder %s2508_s30, %s3098_s6 }
  0x2d   : > { %p2511_p1 = pnand %p2509_p2, %p2482_p13 }
  0x2f   : > { %p2512_p6 = pneg %p2511_p1 }
  0x31   : > { %p2517_p3 = pnand %p2515_p10, %p2512_p6 }
  0x33   : > { %2520 = shalt.err (!%p2517_p3)
}
  0x34   : > { %s2521_s13 = scalar_lea.vmem %s2770_s16, 8192  ;;  %p2529_p12 = scmp.lt.s32.totalorder %s2770_s16, %s2770_s16 }
  0x35   : > { %p2522_p5 = scmp.ne.s32.totalorder %s2770_s16, %s2521_s13  ;;  %p2530_p0 = scmp.lt.s32.totalorder %s2521_s13, %s2521_s13 }
  0x37   : > { %p2524_p7 = pnand %p2522_p5, %p2482_p13  ;;  %p2531_p2 = por %p2530_p0, %p2529_p12 }
  0x39   : > { %p2525_p9 = pneg %p2524_p7 }
  0x3b   : > { %p2532_p1 = pnand %p2531_p2, %p2525_p9 }
  0x3d   : > { %2535 = shalt.err (!%p2532_p1)
}
  0x3e   : > { %s2642_s11 = smov 64   ;;  %s2643_s12 = smov 4  }
  0x3f   : > { %2321 = dma.hbm_to_vmem [thread:$0]  (!%p2766_p11), %s3098_s6, 8192, %s2770_s16, [#allocation6], %s2642_s11, %s2642_s11, %s2643_s12  }
  0x40   : > { %s2825_s17 = sadd.s32 1, %s2636_s24   ;;  %s36_s19 = sadd.s32 1, %s2632_s23 }
  0x41   : > { %s33_s18 = ssub.s32 %s2636_s24, %s2825_s17  ;;  %p43_p6 = scmp.ne.s32.totalorder %s2632_s23, %s2628_s22 }
  0x42   : > { %p34_p13 = scmp.eq.s32.totalorder %s33_s18, 0  ;;  %p44_p10 = scmp.eq.s32.totalorder %s2636_s24, 0 }
  0x43   : > { %p3119_p5 = scmp.eq.s32.totalorder %s2736_s25, 1  ;;  %p2332_p9 = scmp.lt.s32.totalorder %s2636_s24, 2 }
  0x44   : > { %s2834_s20 = scalar_select %p34_p13, %s2632_s23, %s36_s19  }
  0x45   : > { %p45_p3 = por %p44_p10, %p43_p6  ;;  %p2838_p7 = por %p3119_p5, %p43_p6 }
  0x46   : > { %s383_s14 = sand.u32 1, %s2632_s23   ;;  %s2008_s16 = sshll.u32 %s2636_s24, 7 }
  0x47   : > { %s3120_s26 = scalar_select %p2838_p7, 1, 0 }
  0x48   : > { %s2007_s30 = sshll.u32 %s383_s14, 3  ;;  %s2848_s11 = scalar_lea.hbm %s3092_s0, %s2008_s16 }
  0x49   : > { %s387_s12 = scalar_lea.vmem [#allocation2], %s2007_s30  ;;  %p2852_p11 = pnand %p2332_p9, %p45_p3 }
  0x4a   : > { %s394_s21 = sshll.u32 %s387_s12, 4  ;;  %s384_s18 = scalar_lea.sflag [#allocation3], %s383_s14  ;;  %s2850_s21 = int_to_ptr.vmem [resolvable:$true] %s394_s21 }
  0x4b   : > { %s2536_s19 = scalar_lea.hbm %s2848_s11, 128  ;;  %p2538_p0 = pneg %p2852_p11 }
  0x4c   : > { %p2537_p12 = scmp.ne.s32.totalorder %s2848_s11, %s2536_s19  ;;  %s2541_s15 = scalar_lea.hbm %s3092_s0, 256 }
  0x4d   : > { %p2542_p13 = scmp.lt.u32.totalorder %s2848_s11, %s3092_s0  ;;  %p2543_p6 = scmp.lt.u32.totalorder %s2541_s15, %s2536_s19 }
  0x4e   : > { %p2539_p2 = pnand %p2538_p0, %p2537_p12  ;;  %p2545_p3 = scmp.lt.u32.totalorder %s2536_s19, %s2848_s11 }
  0x4f   : > { %p2544_p10 = por %p2543_p6, %p2542_p13 }
  0x50   : > { %p2540_p1 = pneg %p2539_p2 }
  0x51   : > { %p2546_p5 = por %p2545_p3, %p2544_p10 }
  0x53   : > { %p2547_p9 = pnand %p2546_p5, %p2540_p1 }
  0x55   : > { %2550 = shalt.err (!%p2547_p9)
}
  0x56   : > { %s2551_s14 = scalar_lea.vmem %s2850_s21, 128  ;;  %s2644_s16 = smov [#allocation2]  }
  0x57   : > { %p2552_p12 = scmp.ne.s32.totalorder %s2850_s21, %s2551_s14  ;;  %s2556_s30 = sshll.u32 %s2644_s16, 4  ;;  %s2557_s30 = int_to_ptr.vmem [resolvable:$false] %s2556_s30 }
  0x58   : > { %s2558_s13 = scalar_lea.vmem %s2557_s30, 256  ;;  %p2559_p4 = scmp.lt.s32.totalorder %s2850_s21, %s2557_s30 }
  0x59   : > { %p2554_p2 = pnand %p2552_p12, %p2538_p0  ;;  %p2560_p13 = scmp.lt.s32.totalorder %s2558_s13, %s2551_s14 }
  0x5b   : > { %p2555_p7 = pneg %p2554_p2  ;;  %p2561_p6 = por %p2560_p13, %p2559_p4 }
  0x5d   : > { %p2562_p10 = pnand %p2561_p6, %p2555_p7 }
  0x5f   : > { %2565 = shalt.err (!%p2562_p10)
}
  0x60   : > { %2325 = dma.hbm_to_vmem [thread:$0]  (!%p2852_p11), %s2848_s11, 128, %s2850_s21, %s384_s18  }
  0x61   : > { %403 = sbr.rel (%p2755_p8) target bundleno = 1540 (0x604), region = 68  ;;  %s2884_s19 = sand.u32 (!%p2755_p8), 1, %s2628_s22  }
  0x62   : > { %s2010_s15 = sshll.u32 (!%p2755_p8), %s2884_s19, 3  ;;  %s406_s12 = scalar_lea.sflag (!%p2755_p8), [#allocation3], %s2884_s19 }
  0x63   : > { %s409_s14 = scalar_lea.vmem (!%p2755_p8), [#allocation2], %s2010_s15  ;;  %p3122_p4 = scmp.ne.s32.totalorder (!%p2755_p8), %s3114_s27, 0 }
  0x68   : > { %2611 = dma.done.wait (%p3122_p4), %s406_s12, 128  }
  0x69   : > { %2613 = vsyncadd (%p3122_p4), %s406_s12, 4294967168  ;;  %p3123_p7 = scmp.eq.s32.totalorder %s2736_s25, 0 }
  0x6b   : > { %2615 = dma.done.wait (%p3123_p7), [#allocation6], 12288   ;;  %p3124_p8 = pmov %p3123_p7 }
  0x6c   : > { %v2645_v0 = vmov 0.0|0.0   ;;  %vm2646_vm0 = vmmov 0   ;;  %v2647_v1 = vmov 0.0   ;;  %v460_v2 = vld [vmem:[%s3093_s1] sm:$0xff]  ;;  %v461_v3 = vld [vmem:[%s3093_s1 + $0x8] sm:$0xff]  ;;  %v565_v5 = vld [vmem:[#allocation5] sm:$0xff]  ;;  %v558_v28 = vlaneseq }
  0x6d   : > { %2617 = vsyncadd (%p3124_p8), [#allocation6], 4294955008  ;;  %2300 = vmatprep.subr.bf16.mxu0 %v2645_v0  ;;  %2257 = vmatprep.mubr.msk.f32.mxu0 %vm2646_vm0, %v2647_v1  ;;  %v2301_v4 = vpack.c.bf16 %v461_v3, %v460_v2  ;;  %v566_v6 = vld [vmem:[#allocation5 + $0x20] sm:$0xff]  ;;  %vm467_vm1 = vcmask 1042432   ;;  %vm463_vm2 = vcmask 154624   ;;  %v459_v10 = vld [vmem:[%s409_s14] sm:$0xff] }
  0x6e   : > { %v462_v7 = vld [vmem:[%s3093_s1 + $0x10] sm:$0x7]  ;;  %v2019_v11 = vcombine.high %v565_v5, %v566_v6  ;;  %v2018_v12 = vcombine.low %v565_v5, %v566_v6  ;;  %v2648_v22 = vmov 0   ;;  %v706_v24 = vld [vmem:[#allocation5 + $0x8] sm:$0xff]  ;;  %v541_v29 = vld [vmem:[%s3095_s3] sm:$0x1] }
  0x6f   : > { %v567_v8 = vld [vmem:[#allocation5 + $0x40] sm:$0xff]  ;;  %2302 = vmatpush3.bf16.msra.mxu0 %v2301_v4  ;;  %v707_v25 = vld [vmem:[#allocation5 + $0x28] sm:$0xff]  ;;  %v2914_v30 = vshrl.u32 %v558_v28, 7  ;;  %vm542_vm3 = vcmp.gt.f32.partialorder %v541_v29, 0.5  ;;  %v2016_v37 = vld [vmem:[%s3094_s2] ss:$0 sm:$0xff] }
  0x70   : > { %v568_v9 = vld [vmem:[#allocation5 + $0x60] sm:$0xff]  ;;  %2255 = vmatprep.subr.mxu0 %v2647_v1  ;;  %v2028_v26 = vcombine.high %v706_v24, %v707_v25  ;;  %v2027_v27 = vcombine.low %v706_v24, %v707_v25  ;;  %v557_v32 = vsel %vm542_vm3, 1, %v2648_v22  ;;  %v708_v40 = vld [vmem:[#allocation5 + $0x48] sm:$0xff]  ;;  %vm625_vm7 = vcmask 523264   ;;  %v2382_v59 = vld [vmem:[#allocation7 + $0x50] sm:$0xff]   ;;  %s3125_s11 = sld [smem:[#allocation14_spill]] }
  0x71   : > { %v2021_v13 = vcombine.high %v567_v8, %v568_v9  ;;  %v2020_v14 = vcombine.low %v567_v8, %v568_v9  ;;  %v569_v15 = vld [vmem:[#allocation5 + $0x80] sm:$0xff]  ;;  %v2917_v31 = vsub.s32 0, %v2914_v30  ;;  %v709_v41 = vld [vmem:[#allocation5 + $0x68] sm:$0xff]  ;;  %v2383_v60 = vld [vmem:[#allocation7 + $0x10] sm:$0xff]   ;;  %s2138_s21 = sshll.u32 %s2736_s25, 7  ;;  %s457_s27 = scalar_lea.vmem [#allocation8], %s2010_s15 }
  0x72   : > { %v570_v16 = vld [vmem:[#allocation5 + $0xa0] sm:$0xff]  ;;  %v2030_v45 = vcombine.high %v708_v40, %v709_v41  ;;  %v710_v46 = vld [vmem:[#allocation5 + $0x88] sm:$0xff]  ;;  %v2029_v48 = vcombine.low %v708_v40, %v709_v41  ;;  %v2384_v61 = vld [vmem:[#allocation7 + $0x58] sm:$0xff]   ;;  %s1913_s28 = sshll.u32 %s457_s27, 4  ;;  %s3126_s30 = sld [smem:[#allocation15_spill]]  ;;  %s3049_s28 = int_to_ptr.vmem [resolvable:$true] %s1913_s28 }
  0x73   : > { %2256 = vmatpush3.msk.msra.mxu0 %vm467_vm1, %v462_v7  ;;  %v2023_v17 = vcombine.high %v569_v15, %v570_v16  ;;  %v2022_v18 = vcombine.low %v569_v15, %v570_v16  ;;  %v571_v19 = vld [vmem:[#allocation5 + $0xc0] sm:$0xff]  ;;  %v561_v33 = vrot.slane %v557_v32, %v2917_v31  ;;  %v711_v47 = vld [vmem:[#allocation5 + $0xa8] sm:$0xff]  ;;  %v2385_v62 = vld [vmem:[#allocation7 + $0x18] sm:$0xff]   ;;  %v2936_v32 = vsub.s32 1, %v2914_v30  ;;  %s1900_s12 = scalar_lea.sflag [#allocation4], %s2884_s19  ;;  %s2566_s14 = scalar_lea.vmem %s3049_s28, 128 }
  0x74   : > { %2258 = vmatmul.mubr.msk.f32.vlgmr.msra.gmra.mrb[0].mxu0 %vm463_vm2, %v459_v10  ;;  %629 = vmatprep.subr.bf16.mxu0 %v2019_v11  ;;  %v572_v20 = vld [vmem:[#allocation5 + $0xe0] sm:$0xff]  ;;  %v2032_v49 = vcombine.high %v710_v46, %v711_v47  ;;  %v712_v50 = vld [vmem:[#allocation5 + $0xc8] sm:$0xff]  ;;  %v2031_v52 = vcombine.low %v710_v46, %v711_v47  ;;  %v2394_v8 = vld [vmem:[#allocation7 + $0xd0] sm:$0xff]   ;;  %p2567_p11 = scmp.ne.s32.totalorder %s3049_s28, %s2566_s14  ;;  %p3127_p0 = scmp.ne.s32.totalorder %s3120_s26, 0 }
  0x75   : > { %630 = vmatpush1.bf16.msra.mxu0 %v2018_v12  ;;  %v2025_v21 = vcombine.high %v571_v19, %v572_v20  ;;  %661 = vmatprep.mubr.bf16.mxu0 %v2648_v22  ;;  %v2024_v23 = vcombine.low %v571_v19, %v572_v20  ;;  %vm562_vm5 = vcmp.eq.s32.totalorder %v561_v33, 1  ;;  %v713_v51 = vld [vmem:[#allocation5 + $0xe8] sm:$0xff]  ;;  %v2378_v55 = vld [vmem:[#allocation7 + $0x40] sm:$0xff]   ;;  %v2395_v9 = vld [vmem:[#allocation7 + $0x90] sm:$0xff]   ;;  %s2649_s25 = smov [#allocation8]  }
  0x76   : > { %631 = vmatprep.subr.bf16.mxu0 %v2021_v13  ;;  %v2034_v53 = vcombine.high %v712_v50, %v713_v51  ;;  %v2033_v54 = vcombine.low %v712_v50, %v713_v51  ;;  %v2379_v56 = vld [vmem:[#allocation7] sm:$0xff]   ;;  %v2380_v57 = vld [vmem:[#allocation7 + $0x48] sm:$0xff]   ;;  %v2396_v10 = vld [vmem:[#allocation7 + $0x70] sm:$0xff]   ;;  %p2568_p1 = pnand %p2567_p11, %p3127_p0  ;;  %s2570_s15 = sshll.u32 %s2649_s25, 4  ;;  %s2571_s15 = int_to_ptr.vmem [resolvable:$false] %s2570_s15 }
  0x77   : > { %v2381_v58 = vld [vmem:[#allocation7 + $0x8] sm:$0xff]   ;;  %v2386_v63 = vld [vmem:[#allocation7 + $0xc0] sm:$0xff]   ;;  %v2397_v11 = vld [vmem:[#allocation7 + $0x30] sm:$0xff]   ;;  %s2572_s29 = scalar_lea.vmem %s2571_s15, 256  ;;  %p2573_p5 = scmp.lt.s32.totalorder %s3049_s28, %s2571_s15 }
  0x78   : > { %v2387_v0 = vld [vmem:[#allocation7 + $0x80] sm:$0xff]   ;;  %2145 = vmatprep.subr.bf16.mxu1 %v2386_v63  ;;  %v2390_v4 = vld [vmem:[#allocation7 + $0xc8] sm:$0xff]   ;;  %v2398_v12 = vld [vmem:[#allocation7 + $0xd8] sm:$0xff]   ;;  %s3047_s13 = scalar_lea.hbm %s3126_s30, %s2138_s21  ;;  %p2569_p3 = pneg %p2568_p1 }
  0x79   : > { %632 = vmatpush1.bf16.msra.mxu0 %v2020_v14  ;;  %v2388_v2 = vld [vmem:[#allocation7 + $0x60] sm:$0xff]   ;;  %2146 = vmatpush3.bf16.msra.mxu1 %v2387_v0  ;;  %v2391_v5 = vld [vmem:[#allocation7 + $0x88] sm:$0xff]   ;;  %v2399_v13 = vld [vmem:[#allocation7 + $0x98] sm:$0xff]   ;;  %p2574_p9 = scmp.lt.s32.totalorder %s2572_s29, %s2566_s14 }
  0x7a   : > { %633 = vmatprep.subr.bf16.mxu0 %v2023_v17  ;;  %v2389_v3 = vld [vmem:[#allocation7 + $0x20] sm:$0xff]   ;;  %2147 = vmatprep.subr.bf16.mxu1 %v2390_v4  ;;  %v2392_v6 = vld [vmem:[#allocation7 + $0x68] sm:$0xff]   ;;  %v2400_v14 = vld [vmem:[#allocation7 + $0x78] sm:$0xff]  }
  0x7b   : > { %v2393_v7 = vld [vmem:[#allocation7 + $0x28] sm:$0xff]   ;;  %v2401_v15 = vld [vmem:[#allocation7 + $0x38] sm:$0xff]   ;;  %v2402_v16 = vld [vmem:[#allocation7 + $0xe0] sm:$0xff]   ;;  %p2575_p12 = por %p2574_p9, %p2573_p5 }
  0x7c   : > { %v2403_v17 = vld [vmem:[#allocation7 + $0xa0] sm:$0xff]   ;;  %v2405_v19 = vld [vmem:[#allocation7 + $0xa8] sm:$0xff]   ;;  %v2406_v20 = vld [vmem:[#allocation7 + $0xf0] sm:$0xff]  }
  0x7d   : > { %634 = vmatpush1.bf16.msra.mxu0 %v2022_v18  ;;  %2148 = vmatpush3.bf16.msra.mxu1 %v2391_v5  ;;  %v2404_v18 = vld [vmem:[#allocation7 + $0xe8] sm:$0xff]   ;;  %v2409_v24 = vld [vmem:[#allocation7 + $0xb8] sm:$0xff]   ;;  %v1115_v25 = vld [vmem:[#allocation5 + $0x10] sm:$0xff]  ;;  %p2576_p2 = pnand %p2575_p12, %p2569_p3 }
  0x7e   : > { %635 = vmatprep.subr.bf16.mxu0 %v2025_v21  ;;  %2149 = vmatprep.subr.bf16.mxu1 %v2394_v8  ;;  %v2407_v21 = vld [vmem:[#allocation7 + $0xb0] sm:$0xff]  }
  0x7f   : > { %v573_v29 = vld [vmem:[%s3097_s5] sm:$0x3]  ;;  %v714_v41 = vld [vmem:[%s3097_s5 + $0x2] sm:$0x3] }
  0x80   : > { %v578_v33 = vrot.slane %v573_v29, %v2917_v31  ;;  %v719_v30 = vrot.slane %v714_v41, %v2917_v31 }
  0x81   : > { %636 = vmatpush1.bf16.msra.mxu0 %v2024_v23  ;;  %2150 = vmatpush3.bf16.msra.mxu1 %v2395_v9  ;;  %v2408_v23 = vld [vmem:[#allocation7 + $0xf8] sm:$0xff]  }
  0x82   : > { %766 = vmatprep.subr.bf16.mxu0 %v2028_v26  ;;  %2151 = vmatprep.subr.bf16.mxu1 %v2398_v12  ;;  %v1116_v26 = vld [vmem:[#allocation5 + $0x30] sm:$0xff] }
  0x83   : > { %v2068_v28 = vcombine.low %v1115_v25, %v1116_v26 }
  0x85   : > { %2152 = vmatpush3.bf16.msra.mxu1 %v2399_v13 }
  0x86   : > { %2153 = vmatprep.subr.bf16.mxu1 %v2402_v16 }
  0x89   : > { %2154 = vmatpush3.bf16.msra.mxu1 %v2403_v17 }
  0x8a   : > { %2155 = vmatprep.subr.bf16.mxu1 %v2404_v18  ;;  %v1395_v18 = vld [vmem:[#allocation5 + $0xd8] sm:$0xff] }
  0x8d   : > { %2156 = vmatpush3.bf16.msra.mxu1 %v2405_v19  ;;  %v1396_v19 = vld [vmem:[#allocation5 + $0xf8] sm:$0xff] }
  0x8e   : > { %2157 = vmatprep.subr.bf16.mxu1 %v2406_v20 }
  0x91   : > { %2158 = vmatpush3.bf16.msra.mxu1 %v2407_v21  ;;  %v2100_v21 = vcombine.high %v1395_v18, %v1396_v19 }
  0x92   : > { %2159 = vmatprep.subr.bf16.mxu1 %v2408_v23  ;;  %v2099_v23 = vcombine.low %v1395_v18, %v1396_v19 }
  0x95   : > { %2160 = vmatpush3.bf16.msra.mxu1 %v2409_v24  ;;  %v2410_v24 = vld [vmem:[#allocation7 + $0x140] sm:$0xff]  }
 0x147   : > { %v537_v34 = vpop.f32.mrb[0].mxu0 }
 0x148   : > { %vm543_vm4 = vcmp.lt.f32.partialorder %v537_v34, 0.0  ;;  %v544_v35 = vceil.f32 %v537_v34  ;;  %v545_v36 = vfloor.f32 %v537_v34  ;;  %v2259_v38 = vpop.f32.mrb[1].mxu0 }
 0x14a   : > { %v546_v39 = vsel %vm543_vm4, %v544_v35, %v545_v36 }
 0x14b   : > { %vm554_vm6 = vcmp.eq.f32.partialorder %v546_v39, %v2016_v37 }
 0x14c   : > { %v2017_v42 = vsel %vm554_vm6, 1.0, %v2647_v1 }
 0x14d   : > { %v563_v43 = vsel %vm562_vm5, %v2017_v42, %v537_v34  ;;  %v582_v34 = vrot.slane %v573_v29, %v2936_v32  ;;  %v2416_v29 = vld [vmem:[#allocation7 + $0x158] sm:$0xff]  }
 0x14e   : > { %v2925_v44 = vpack.c.bf16 %v563_v43, %v563_v43 }
 0x150   : > { %2026 = vmatmul.mubr.msk.bf16.vlgmr.msra.gmra.mrb[4].mxu0 %vm625_vm7, %v2925_v44 }
 0x151   : > { %767 = vmatpush1.bf16.msra.mxu0 %v2027_v27  ;;  %798 = vmatprep.mubr.bf16.mxu0 %v2648_v22  ;;  %v2069_v27 = vcombine.high %v1115_v25, %v1116_v26  ;;  %v2411_v25 = vld [vmem:[#allocation7 + $0x100] sm:$0xff]   ;;  %v2413_v26 = vld [vmem:[#allocation7 + $0x108] sm:$0xff]  }
 0x152   : > { %768 = vmatprep.subr.bf16.mxu0 %v2030_v45  ;;  %v723_v45 = vrot.slane %v714_v41, %v2936_v32  ;;  %v2426_v41 = vld [vmem:[#allocation7 + $0x170] sm:$0xff]  }
 0x153   : > { %1175 = vmatprep.subr.bf16.mxu1 %v2069_v27  ;;  %v2414_v27 = vld [vmem:[#allocation7 + $0x150] sm:$0xff]  }
 0x155   : > { %769 = vmatpush1.bf16.msra.mxu0 %v2029_v48 }
 0x156   : > { %770 = vmatprep.subr.bf16.mxu0 %v2032_v49 }
 0x159   : > { %771 = vmatpush1.bf16.msra.mxu0 %v2031_v52 }
 0x15a   : > { %772 = vmatprep.subr.bf16.mxu0 %v2034_v53 }
 0x15d   : > { %773 = vmatpush1.bf16.msra.mxu0 %v2033_v54 }
 0x15e   : > { %2167 = vmatprep.subr.bf16.mxu0 %v2378_v55  ;;  %v1117_v55 = vld [vmem:[#allocation5 + $0x50] sm:$0xff] }
 0x160   : > { %2035 = vmatmul.mubr.msk.bf16.vlgmr.msra.gmra.mrb[8].mxu0 %vm625_vm7, %v2925_v44 }
 0x161   : > { %2168 = vmatpush3.bf16.msra.mxu0 %v2379_v56  ;;  %v1118_v56 = vld [vmem:[#allocation5 + $0x70] sm:$0xff] }
 0x162   : > { %2169 = vmatprep.subr.bf16.mxu0 %v2380_v57  ;;  %v2070_v63 = vcombine.low %v1117_v55, %v1118_v56 }
 0x165   : > { %2170 = vmatpush3.bf16.msra.mxu0 %v2381_v58 }
 0x166   : > { %2171 = vmatprep.subr.bf16.mxu0 %v2382_v59 }
 0x169   : > { %2172 = vmatpush3.bf16.msra.mxu0 %v2383_v60  ;;  %v2071_v60 = vcombine.high %v1117_v55, %v1118_v56  ;;  %v2440_v55 = vld [vmem:[#allocation7 + $0x1f8] sm:$0xff]  }
 0x16a   : > { %2173 = vmatprep.subr.bf16.mxu0 %v2384_v61  ;;  %v1119_v61 = vld [vmem:[#allocation5 + $0x90] sm:$0xff]  ;;  %v2441_v56 = vld [vmem:[#allocation7 + $0x1b8] sm:$0xff]  }
 0x16d   : > { %2174 = vmatpush3.bf16.msra.mxu0 %v2385_v62  ;;  %v1120_v62 = vld [vmem:[#allocation5 + $0xb0] sm:$0xff] }
 0x16e   : > { %2175 = vmatprep.subr.bf16.mxu0 %v2388_v2  ;;  %v2073_v0 = vcombine.high %v1119_v61, %v1120_v62  ;;  %v1121_v2 = vld [vmem:[#allocation5 + $0xd0] sm:$0xff]  ;;  %v2072_v4 = vcombine.low %v1119_v61, %v1120_v62 }
 0x171   : > { %2176 = vmatpush3.bf16.msra.mxu0 %v2389_v3  ;;  %v1122_v3 = vld [vmem:[#allocation5 + $0xf0] sm:$0xff] }
 0x172   : > { %2177 = vmatprep.subr.bf16.mxu0 %v2392_v6  ;;  %v2075_v5 = vcombine.high %v1121_v2, %v1122_v3  ;;  %v1389_v6 = vld [vmem:[#allocation5 + $0x18] sm:$0xff]  ;;  %v2074_v8 = vcombine.low %v1121_v2, %v1122_v3 }
 0x175   : > { %2178 = vmatpush3.bf16.msra.mxu0 %v2393_v7  ;;  %v1390_v7 = vld [vmem:[#allocation5 + $0x38] sm:$0xff] }
 0x176   : > { %2179 = vmatprep.subr.bf16.mxu0 %v2396_v10  ;;  %v2094_v9 = vcombine.high %v1389_v6, %v1390_v7  ;;  %v1391_v10 = vld [vmem:[#allocation5 + $0x58] sm:$0xff]  ;;  %v2093_v12 = vcombine.low %v1389_v6, %v1390_v7 }
 0x179   : > { %2180 = vmatpush3.bf16.msra.mxu0 %v2397_v11  ;;  %v1392_v11 = vld [vmem:[#allocation5 + $0x78] sm:$0xff] }
 0x17a   : > { %2181 = vmatprep.subr.bf16.mxu0 %v2400_v14  ;;  %v2096_v13 = vcombine.high %v1391_v10, %v1392_v11  ;;  %v1393_v14 = vld [vmem:[#allocation5 + $0x98] sm:$0xff]  ;;  %v2095_v16 = vcombine.low %v1391_v10, %v1392_v11 }
 0x17d   : > { %2182 = vmatpush3.bf16.msra.mxu0 %v2401_v15  ;;  %v1394_v15 = vld [vmem:[#allocation5 + $0xb8] sm:$0xff] }
 0x17e   : > { %v2098_v17 = vcombine.high %v1393_v14, %v1394_v15  ;;  %v2097_v20 = vcombine.low %v1393_v14, %v1394_v15  ;;  %2189 = vmatprep.subr.bf16.mxu0 %v2410_v24  ;;  %v1397_v14 = vld [vmem:[%s3097_s5 + $0x6] sm:$0x3] }
 0x17f   : > { %v1406_v18 = vrot.slane %v1397_v14, %v2936_v32 }
 0x223   : > { %v663_v35 = vpop.f32.mrb[4].mxu0 }
 0x224   : > { %v664_v36 = vadd.f32 %v663_v35, %v578_v33  ;;  %v665_v37 = vpop.f32.mrb[5].mxu0  ;;  %v2417_v33 = vld [vmem:[#allocation7 + $0x118] sm:$0xff]   ;;  %v2419_v35 = vld [vmem:[#allocation7 + $0x1c0] sm:$0xff]  }
 0x225   : > { %v666_v38 = vadd.f32 %v665_v37, %v582_v34  ;;  %v667_v39 = vpop.f32.mrb[6].mxu0  ;;  %v2418_v34 = vld [vmem:[#allocation7 + $0x160] sm:$0xff]   ;;  %v2422_v37 = vld [vmem:[#allocation7 + $0x168] sm:$0xff]  }
 0x226   : > { %2458 = vtanh.f32 %v664_v36  ;;  %v668_v40 = vpop.f32.mrb[7].mxu0  ;;  %v2420_v36 = vld [vmem:[#allocation7 + $0x120] sm:$0xff]   ;;  %v2424_v39 = vld [vmem:[#allocation7 + $0x128] sm:$0xff]  }
 0x227   : > { %2460 = vtanh.f32 %v666_v38  ;;  %v2423_v38 = vld [vmem:[#allocation7 + $0x1c8] sm:$0xff]  }
 0x228   : > { %v2425_v40 = vld [vmem:[#allocation7 + $0x188] sm:$0xff]  }
 0x230   : > { %v2459_v42 = vpop.eup %2458 }
 0x231   : > { %v2461_v43 = vpop.eup %2460  ;;  %v672_v47 = vpack.c.bf16 %v2459_v42, %v2459_v42  ;;  %v2427_v42 = vld [vmem:[#allocation7 + $0x1d0] sm:$0xff]  }
 0x232   : > { %v673_v46 = vpack.c.bf16 %v2461_v43, %v2461_v43  ;;  %v2429_v43 = vld [vmem:[#allocation7 + $0x190] sm:$0xff]  }
 0x233   : > { %v800_v48 = vpop.f32.mrb[8].mxu0 }
 0x234   : > { %v801_v49 = vadd.f32 %v800_v48, %v719_v30  ;;  %v802_v50 = vpop.f32.mrb[9].mxu0  ;;  %1107 = vmatprep.mubr.bf16.mxu0 %v673_v46  ;;  %v2428_v30 = vld [vmem:[#allocation7 + $0x130] sm:$0xff]   ;;  %v2431_v46 = vld [vmem:[#allocation7 + $0x1d8] sm:$0xff]  }
 0x235   : > { %v803_v51 = vadd.f32 %v802_v50, %v723_v45  ;;  %v804_v52 = vpop.f32.mrb[10].mxu0  ;;  %1108 = vmatmul.mubr.bf16.vlgmr.msra.gmra.mrb[12].mxu0 %v672_v47  ;;  %v2430_v45 = vld [vmem:[#allocation7 + $0x178] sm:$0xff]   ;;  %v2435_v50 = vld [vmem:[#allocation7 + $0x1a0] sm:$0xff]  }
 0x236   : > { %2462 = vtanh.f32 %v801_v49  ;;  %v805_v53 = vpop.f32.mrb[11].mxu0  ;;  %2190 = vmatpush3.bf16.msra.mxu0 %v2411_v25  ;;  %v2432_v47 = vld [vmem:[#allocation7 + $0x138] sm:$0xff]   ;;  %v2434_v49 = vld [vmem:[#allocation7 + $0x1e0] sm:$0xff]   ;;  %v2437_v52 = vld [vmem:[#allocation7 + $0x1a8] sm:$0xff]  }
 0x237   : > { %2464 = vtanh.f32 %v803_v51  ;;  %v2433_v48 = vld [vmem:[#allocation7 + $0x198] sm:$0xff]   ;;  %v2436_v51 = vld [vmem:[#allocation7 + $0x1e8] sm:$0xff]   ;;  %v2438_v53 = vld [vmem:[#allocation7 + $0x1f0] sm:$0xff]  }
 0x240   : > { %v2463_v54 = vpop.eup %2462 }
 0x241   : > { %v2465_v57 = vpop.eup %2464  ;;  %v809_v59 = vpack.c.bf16 %v2463_v54, %v2463_v54  ;;  %v2439_v54 = vld [vmem:[#allocation7 + $0x1b0] sm:$0xff]  }
 0x242   : > { %v810_v58 = vpack.c.bf16 %v2465_v57, %v2465_v57 }
 0x244   : > { %971 = vmatprep.mubr.bf16.mxu1 %v810_v58 }
 0x245   : > { %972 = vmatmul.mubr.bf16.vlgmr.msra.gmra.mrb[0].mxu1 %v809_v59 }
 0x246   : > { %1176 = vmatpush1.bf16.msra.mxu1 %v2068_v28  ;;  %1207 = vmatprep.mubr.bf16.mxu1 %v2648_v22  ;;  %v2415_v28 = vld [vmem:[#allocation7 + $0x110] sm:$0xff]  }
 0x247   : > { %1177 = vmatprep.subr.bf16.mxu1 %v2071_v60 }
 0x24a   : > { %1178 = vmatpush1.bf16.msra.mxu1 %v2070_v63 }
 0x24b   : > { %1179 = vmatprep.subr.bf16.mxu1 %v2073_v0 }
 0x24e   : > { %1180 = vmatpush1.bf16.msra.mxu1 %v2072_v4 }
 0x24f   : > { %1181 = vmatprep.subr.bf16.mxu1 %v2075_v5  ;;  %v1123_v5 = vld [vmem:[%s3097_s5 + $0x4] sm:$0x3] }
 0x250   : > { %v1128_v6 = vrot.slane %v1123_v5, %v2917_v31  ;;  %v1132_v7 = vrot.slane %v1123_v5, %v2936_v32  ;;  %v2442_v32 = vld [vmem:[%s3100_s8] sm:$0xff]  }
 0x252   : > { %1182 = vmatpush1.bf16.msra.mxu1 %v2074_v8 }
 0x253   : > { %1449 = vmatprep.subr.bf16.mxu1 %v2094_v9 }
 0x255   : > { %2076 = vmatmul.mubr.msk.bf16.vlgmr.msra.gmra.mrb[4].mxu1 %vm625_vm7, %v2925_v44 }
 0x256   : > { %1450 = vmatpush1.bf16.msra.mxu1 %v2093_v12  ;;  %1481 = vmatprep.mubr.bf16.mxu1 %v2648_v22  ;;  %v2412_v22 = vld [vmem:[#allocation7 + $0x148] sm:$0xff]  }
 0x257   : > { %1451 = vmatprep.subr.bf16.mxu1 %v2096_v13  ;;  %2191 = vmatprep.subr.bf16.mxu0 %v2412_v22 }
 0x258   : > { %2192 = vmatpush3.bf16.msra.mxu0 %v2413_v26 }
 0x259   : > { %2193 = vmatprep.subr.bf16.mxu0 %v2414_v27 }
 0x25a   : > { %1452 = vmatpush1.bf16.msra.mxu1 %v2095_v16  ;;  %v1402_v16 = vrot.slane %v1397_v14, %v2917_v31 }
 0x25b   : > { %1453 = vmatprep.subr.bf16.mxu1 %v2098_v17 }
 0x25c   : > { %2194 = vmatpush3.bf16.msra.mxu0 %v2415_v28 }
 0x25d   : > { %2195 = vmatprep.subr.bf16.mxu0 %v2416_v29 }
 0x25e   : > { %1454 = vmatpush1.bf16.msra.mxu1 %v2097_v20 }
 0x25f   : > { %1455 = vmatprep.subr.bf16.mxu1 %v2100_v21 }
 0x260   : > { %2196 = vmatpush3.bf16.msra.mxu0 %v2417_v33  ;;  %v2443_v33 = vld [vmem:[%s3100_s8 + $0x8] sm:$0xff]  }
 0x261   : > { %2197 = vmatprep.subr.bf16.mxu0 %v2418_v34  ;;  %v2444_v34 = vld [vmem:[%s3100_s8 + $0x10] sm:$0xff]  }
 0x262   : > { %1456 = vmatpush1.bf16.msra.mxu1 %v2099_v23 }
 0x263   : > { %2211 = vmatprep.subr.bf16.mxu1 %v2419_v35  ;;  %v2445_v35 = vld [vmem:[%s3100_s8 + $0x18] sm:$0xff]  }
 0x264   : > { %2198 = vmatpush3.bf16.msra.mxu0 %v2420_v36  ;;  %v2446_v36 = vld [vmem:[%s3100_s8 + $0x20] sm:$0xff]  }
 0x265   : > { %2101 = vmatmul.mubr.msk.bf16.vlgmr.msra.gmra.mrb[8].mxu1 %vm625_vm7, %v2925_v44  ;;  %v2421_v44 = vld [vmem:[#allocation7 + $0x180] sm:$0xff]   ;;  %2199 = vmatprep.subr.bf16.mxu0 %v2422_v37 }
 0x266   : > { %2212 = vmatpush3.bf16.msra.mxu1 %v2421_v44  ;;  %v2447_v44 = vld [vmem:[%s3100_s8 + $0x28] sm:$0xff]   ;;  %v2448_v37 = vld [vmem:[%s3100_s8 + $0x30] sm:$0xff]  }
 0x267   : > { %2213 = vmatprep.subr.bf16.mxu1 %v2423_v38  ;;  %v2449_v38 = vld [vmem:[%s3100_s8 + $0x38] sm:$0xff]  }
 0x268   : > { %2200 = vmatpush3.bf16.msra.mxu0 %v2424_v39  ;;  %v2450_v39 = vld [vmem:[%s3102_s10] sm:$0xff]  }
 0x269   : > { %2201 = vmatprep.subr.bf16.mxu0 %v2426_v41  ;;  %v2452_v41 = vld [vmem:[%s3102_s10 + $0x10] sm:$0xff]  }
 0x26a   : > { %2214 = vmatpush3.bf16.msra.mxu1 %v2425_v40  ;;  %v2451_v40 = vld [vmem:[%s3102_s10 + $0x8] sm:$0xff]  }
 0x26b   : > { %2215 = vmatprep.subr.bf16.mxu1 %v2427_v42  ;;  %v2453_v42 = vld [vmem:[%s3102_s10 + $0x18] sm:$0xff]  }
 0x26c   : > { %2202 = vmatpush3.bf16.msra.mxu0 %v2428_v30 }
 0x26d   : > { %2203 = vmatprep.subr.bf16.mxu0 %v2430_v45 }
 0x26e   : > { %2216 = vmatpush3.bf16.msra.mxu1 %v2429_v43 }
 0x26f   : > { %2217 = vmatprep.subr.bf16.mxu1 %v2431_v46 }
 0x270   : > { %2204 = vmatpush3.bf16.msra.mxu0 %v2432_v47 }
 0x271   : > { %2260 = vmatprep.subr.bf16.mxu0 %v2647_v1 }
 0x272   : > { %2218 = vmatpush3.bf16.msra.mxu1 %v2433_v48 }
 0x273   : > { %2219 = vmatprep.subr.bf16.mxu1 %v2434_v49 }
 0x276   : > { %2220 = vmatpush3.bf16.msra.mxu1 %v2435_v50 }
 0x277   : > { %2221 = vmatprep.subr.bf16.mxu1 %v2436_v51 }
 0x27a   : > { %2222 = vmatpush3.bf16.msra.mxu1 %v2437_v52 }
 0x27b   : > { %2223 = vmatprep.subr.bf16.mxu1 %v2438_v53  ;;  %v2118_v53 = vld [vmem:[%s3099_s7] ss:$0 sm:$0xff] }
 0x27e   : > { %2224 = vmatpush3.bf16.msra.mxu1 %v2439_v54 }
 0x27f   : > { %2225 = vmatprep.subr.bf16.mxu1 %v2440_v55 }
 0x282   : > { %2226 = vmatpush3.bf16.msra.mxu1 %v2441_v56 }
 0x283   : > { %2280 = vmatprep.subr.bf16.mxu1 %v2647_v1 }
 0x308   : > { %v2183_v57 = vpop.f32.mrb[12].mxu0 }
 0x309   : > { %v2184_v58 = vpop.f32.mrb[13].mxu0 }
 0x30a   : > { %v2185_v59 = vadd.f32 %v2184_v58, %v2183_v57  ;;  %v2186_v60 = vpop.f32.mrb[14].mxu0 }
 0x30b   : > { %v2187_v61 = vpop.f32.mrb[15].mxu0  ;;  %v2455_v60 = vld [vmem:[%s3102_s10 + $0x28] sm:$0xff]  }
 0x30c   : > { %v2456_v61 = vld [vmem:[%s3102_s10 + $0x30] sm:$0xff]  }
 0x318   : > { %v2161_v62 = vpop.f32.mrb[0].mxu1 }
 0x319   : > { %v2162_v63 = vpop.f32.mrb[1].mxu1 }
 0x31a   : > { %v2163_v0 = vadd.f32 %v2162_v63, %v2161_v62  ;;  %v2164_v2 = vpop.f32.mrb[2].mxu1  ;;  %v2457_v62 = vld [vmem:[%s3102_s10 + $0x38] sm:$0xff]   ;;  %v2119_v63 = vld [vmem:[%s3101_s9] ss:$0 sm:$0xff] }
 0x31b   : > { %v2165_v3 = vpop.f32.mrb[3].mxu1 }
 0x31c   : > { %v2953_v4 = vadd.f32 %v2185_v59, %v2163_v0  ;;  %v2454_v59 = vld [vmem:[%s3102_s10 + $0x20] sm:$0xff]  }
 0x328   : > { %v1209_v8 = vpop.f32.mrb[4].mxu1 }
 0x329   : > { %v1210_v9 = vadd.f32 %v1209_v8, %v1128_v6  ;;  %v1211_v10 = vpop.f32.mrb[5].mxu1 }
 0x32a   : > { %v1212_v11 = vadd.f32 %v1211_v10, %v1132_v7  ;;  %v1213_v12 = vpop.f32.mrb[6].mxu1 }
 0x32b   : > { %2466 = vtanh.f32 %v1210_v9  ;;  %v1214_v13 = vpop.f32.mrb[7].mxu1 }
 0x32c   : > { %2468 = vtanh.f32 %v1212_v11 }
 0x335   : > { %v2467_v15 = vpop.eup %2466 }
 0x336   : > { %v2469_v17 = vpop.eup %2468  ;;  %v1218_v20 = vpack.c.bf16 %v2467_v15, %v2467_v15 }
 0x337   : > { %v1219_v19 = vpack.c.bf16 %v2469_v17, %v2469_v17 }
 0x338   : > { %v1483_v21 = vpop.f32.mrb[8].mxu1 }
 0x339   : > { %v1484_v23 = vadd.f32 %v1483_v21, %v1402_v16  ;;  %1380 = vmatprep.mubr.bf16.mxu0 %v1219_v19  ;;  %v1485_v24 = vpop.f32.mrb[9].mxu1 }
 0x33a   : > { %v1486_v25 = vadd.f32 %v1485_v24, %v1406_v18  ;;  %1381 = vmatmul.mubr.bf16.vlgmr.msra.gmra.mrb[16].mxu0 %v1218_v20  ;;  %v1487_v22 = vpop.f32.mrb[10].mxu1 }
 0x33b   : > { %2470 = vtanh.f32 %v1484_v23  ;;  %v1488_v26 = vpop.f32.mrb[11].mxu1  ;;  %2276 = vmatprep.mubr.msk.bf16.mxu0 %vm2646_vm0, %v2647_v1  ;;  %2261 = vmatpush3.bf16.msra.mxu0 %v2442_v32 }
 0x33c   : > { %2472 = vtanh.f32 %v1486_v25  ;;  %2262 = vmatprep.subr.bf16.mxu0 %v2647_v1 }
 0x33f   : > { %2263 = vmatpush3.bf16.msra.mxu0 %v2443_v33 }
 0x340   : > { %2264 = vmatprep.subr.bf16.mxu0 %v2647_v1 }
 0x343   : > { %2265 = vmatpush3.bf16.msra.mxu0 %v2444_v34 }
 0x344   : > { %2266 = vmatprep.subr.bf16.mxu0 %v2647_v1 }
 0x345   : > { %v2471_v27 = vpop.eup %2470 }
 0x346   : > { %v2473_v31 = vpop.eup %2472  ;;  %v1492_v29 = vpack.c.bf16 %v2471_v27, %v2471_v27 }
 0x347   : > { %v1493_v28 = vpack.c.bf16 %v2473_v31, %v2473_v31  ;;  %2267 = vmatpush3.bf16.msra.mxu0 %v2445_v35 }
 0x348   : > { %2268 = vmatprep.subr.bf16.mxu0 %v2647_v1 }
 0x349   : > { %1654 = vmatprep.mubr.bf16.mxu1 %v1493_v28 }
 0x34a   : > { %1655 = vmatmul.mubr.bf16.vlgmr.msra.gmra.mrb[12].mxu1 %v1492_v29 }
 0x34b   : > { %2296 = vmatprep.mubr.msk.bf16.mxu1 %vm2646_vm0, %v2647_v1  ;;  %2269 = vmatpush3.bf16.msra.mxu0 %v2446_v36 }
 0x34c   : > { %2270 = vmatprep.subr.bf16.mxu0 %v2647_v1  ;;  %2281 = vmatpush3.bf16.msra.mxu1 %v2450_v39 }
 0x34d   : > { %2282 = vmatprep.subr.bf16.mxu1 %v2647_v1 }
 0x34f   : > { %2271 = vmatpush3.bf16.msra.mxu0 %v2447_v44 }
 0x350   : > { %2272 = vmatprep.subr.bf16.mxu0 %v2647_v1  ;;  %2283 = vmatpush3.bf16.msra.mxu1 %v2451_v40 }
 0x351   : > { %2284 = vmatprep.subr.bf16.mxu1 %v2647_v1 }
 0x353   : > { %2273 = vmatpush3.bf16.msra.mxu0 %v2448_v37 }
 0x354   : > { %2274 = vmatprep.subr.bf16.mxu0 %v2647_v1  ;;  %2285 = vmatpush3.bf16.msra.mxu1 %v2452_v41 }
 0x355   : > { %2286 = vmatprep.subr.bf16.mxu1 %v2647_v1 }
 0x357   : > { %2275 = vmatpush3.bf16.msra.mxu0 %v2449_v38 }
 0x358   : > { %2287 = vmatpush3.bf16.msra.mxu1 %v2453_v42 }
 0x359   : > { %2288 = vmatprep.subr.bf16.mxu1 %v2647_v1 }
 0x35c   : > { %2289 = vmatpush3.bf16.msra.mxu1 %v2454_v59 }
 0x35d   : > { %2290 = vmatprep.subr.bf16.mxu1 %v2647_v1 }
 0x360   : > { %2291 = vmatpush3.bf16.msra.mxu1 %v2455_v60 }
 0x361   : > { %2292 = vmatprep.subr.bf16.mxu1 %v2647_v1 }
 0x364   : > { %2293 = vmatpush3.bf16.msra.mxu1 %v2456_v61 }
 0x365   : > { %2294 = vmatprep.subr.bf16.mxu1 %v2647_v1  ;;  %v2128_v1 = vld [vmem:[%s3125_s11] ss:$0 sm:$0xff] }
 0x368   : > { %2295 = vmatpush3.bf16.msra.mxu1 %v2457_v62 }
 0x40d   : > { %v2205_v30 = vpop.f32.mrb[16].mxu0 }
 0x40e   : > { %v2206_v43 = vpop.f32.mrb[17].mxu0 }
 0x40f   : > { %v2207_v45 = vadd.f32 %v2206_v43, %v2205_v30  ;;  %v2208_v46 = vpop.f32.mrb[18].mxu0 }
 0x410   : > { %v2209_v47 = vpop.f32.mrb[19].mxu0 }
 0x411   : > { %v1388_v48 = vadd.f32 %v2207_v45, %v2953_v4 }
 0x41d   : > { %v2227_v49 = vpop.f32.mrb[12].mxu1 }
 0x41e   : > { %v2228_v50 = vpop.f32.mrb[13].mxu1 }
 0x41f   : > { %v2229_v51 = vadd.f32 %v2228_v50, %v2227_v49  ;;  %v2230_v52 = vpop.f32.mrb[14].mxu1 }
 0x420   : > { %v2231_v54 = vpop.f32.mrb[15].mxu1 }
 0x421   : > { %v1662_v55 = vadd.f32 %v2229_v51, %v1388_v48 }
 0x423   : > { %v1670_v56 = vadd.f32 %v2118_v53, %v1662_v55 }
 0x425   : > { %2474 = vtanh.f32 %v1670_v56 }
 0x42f   : > { %v2475_v57 = vpop.eup %2474 }
 0x430   : > { %v1672_v58 = vpack.c.bf16 %v2475_v57, %v2475_v57 }
 0x432   : > { %2277 = vmatmul.mubr.bf16.vlgmr.msra.gmra.mrb[20].mxu0 %v1672_v58 }
 0x505   : > { %v1778_v0 = vpop.f32.mrb[20].mxu0 }
 0x506   : > { %v1779_v2 = vadd.f32 %v2119_v63, %v1778_v0  ;;  %v2278_v3 = vpop.f32.mrb[21].mxu0 }
 0x507   : > { %v1781_v4 = vpop.f32.mrb[22].mxu0 }
 0x508   : > { %2476 = vtanh.f32 %v1779_v2  ;;  %v2279_v5 = vpop.f32.mrb[23].mxu0 }
 0x512   : > { %v2477_v6 = vpop.eup %2476 }
 0x513   : > { %v1785_v7 = vpack.c.bf16 %v2477_v6, %v2477_v6 }
 0x515   : > { %2297 = vmatmul.mubr.bf16.vlgmr.msra.gmra.mrb[16].mxu1 %v1785_v7 }
 0x5e8   : > { %v1891_v8 = vpop.f32.mrb[16].mxu1 }
 0x5e9   : > { %v1892_v9 = vadd.f32 %v2128_v1, %v1891_v8  ;;  %v2298_v10 = vpop.f32.mrb[17].mxu1 }
 0x5ea   : > { %v1894_v11 = vpop.f32.mrb[18].mxu1 }
 0x5eb   : > { %2478 = vtanh.f32 %v1892_v9  ;;  %v2299_v12 = vpop.f32.mrb[19].mxu1 }
 0x5f5   : > { %v2479_v13 = vpop.eup %2478 }
 0x5f6   : > { %1898 = vst.msk [vmem:[%s457_s27] sm:$0xff] %vm625_vm7, %v2479_v13 }
 0x5f7   : > { %2579 = shalt.err (!%p2576_p2)
}
 0x5f8   : > { %s2580_s19 = scalar_lea.hbm %s3047_s13, 128  ;;  %s2584_s27 = scalar_lea.hbm %s3126_s30, 256 }
 0x5f9   : > { %p2581_p13 = scmp.ne.s32.totalorder %s3047_s13, %s2580_s19  ;;  %p2585_p4 = scmp.lt.u32.totalorder %s3047_s13, %s3126_s30 }
 0x5fa   : > { %p2586_p7 = scmp.lt.u32.totalorder %s2584_s27, %s2580_s19  ;;  %p2588_p11 = scmp.lt.u32.totalorder %s2580_s19, %s3047_s13 }
 0x5fb   : > { %p2582_p6 = pnand %p2581_p13, %p3127_p0 }
 0x5fc   : > { %p2587_p8 = por %p2586_p7, %p2585_p4 }
 0x5fd   : > { %p2583_p10 = pneg %p2582_p6 }
 0x5fe   : > { %p2589_p1 = por %p2588_p11, %p2587_p8 }
 0x600   : > { %p2590_p3 = pnand %p2589_p1, %p2583_p10 }
 0x602   : > { %2593 = shalt.err (!%p2590_p3)
}
 0x603   : > { %2313 = dma.vmem_to_hbm [thread:$0]  (%p3127_p0), %s3049_s28, 128, %s3047_s13, %s1900_s12  }
 0x604 PF: > { %s3128_s14 = sld [smem:[#allocation12_spill]]  ;;  %s3129_s25 = sld [smem:[#allocation13_spill]] }
 0x605   : > { %p3131_p9 = scmp.ge.s32.totalorder %s2636_s24, 2 }
 0x60a   : > { %s1925_s15 = sand.u32 1, %s3128_s14   ;;  %p3130_p5 = scmp.ne.s32.totalorder %s3129_s25, 0 }
 0x60b   : > { %s1926_s29 = scalar_lea.sflag [#allocation4], %s1925_s15 }
 0x60c   : > { %p2327_p12 = pnand %p3131_p9, %p3130_p5 }
 0x60e   : > { %2619 = dma.done.wait (!%p2327_p12), %s1926_s29, 128  }
 0x60f   : > { %2621 = vsyncadd (!%p2327_p12), %s1926_s29, 4294967168  ;;  %p26_p2 = scmp.ge.s32.totalorder %s2825_s17, 4   ;;  %s3132_s21 = smov %s2628_s22 }
 0x610   : > { %s3133_s22 = smov %s2632_s23  ;;  %s3134_s23 = smov %s2834_s20 }
 0x611   : > { %s3135_s24 = smov %s2825_s17  ;;  %28 = sbr.rel (!%p26_p2) target bundleno = 9 (0x9), region = 121 }
 0x618   :  { %1931 = vsyncpa [#allocation3], 1 }
 0x619   :  { %1933 = vsyncpa [#allocation3 + $0x1], 1 }
 0x61a   :  { %1934 = vsyncpa [#allocation6], 1 }
 0x61b   :  { %1935 = vsyncpa [#allocation4], 1 }
 0x61c   :  { %1937 = vsyncpa [#allocation4 + $0x1], 1 }

</bundles_post_ra>
